<compile_context>
chip_gen: v5e
topology: v5e:2x2
jax: 0.10.0
libtpu: 0.0.40
codegen_flags: <defaults>
</compile_context>

<pallas_src>
import jax
import jax.numpy as jnp
from jax.experimental import pallas as pl
from jax.experimental.pallas import tpu as pltpu


def _output_block_kernel(x_ref, wc_ref, bc_ref, g_ref, bln_ref,
                         w1_ref, b1_ref, w2_ref, b2_ref, o_ref):
    """One grid step = one batch tile of Bt elements, each handled as small
    weights-on-left 2-D matmuls in the native [C, N] orientation.

      x_ref : (Bt, KC, N) f32   KC = Cin*Ko (free view of the NCHW input)
      wc_ref: (2*C1, KC) bf16   conv weight, GLU residual folded into rows [0,C1)
      bc_ref: (2*C1, 1)  f32    conv bias
      g_ref / bln_ref: (C1, N) f32   LayerNorm gamma/beta (pre-transposed)
      w1_ref: (C2, C1) bf16     b1_ref: (C2, 1) f32
      w2_ref: (Ce, C2) bf16     b2_ref: (Ce, 1) f32
      o_ref : (Bt, Ce, N) f32
    """
    bt = x_ref.shape[0]
    c1, n = g_ref.shape
    inv_cnt = 1.0 / float(c1 * n)

    wc = wc_ref[...]
    bc = bc_ref[...]
    g = g_ref[...]
    bln = bln_ref[...]
    w1 = w1_ref[...]
    b1 = b1_ref[...]
    w2 = w2_ref[...]
    b2 = b2_ref[...]

    # Bt is small and static -> unrolled Python loop (no per-step grid overhead).
    for b in range(bt):
        # bf16 cast in-kernel avoids a separate XLA cast pass over the input.
        xb = x_ref[b].astype(jnp.bfloat16)                               # [KC, N]

        # Causal temporal conv (kernel (Ko,1), T_out=1) as ONE MXU matmul; the
        # identity-Align GLU residual is already folded into the first C1 rows.
        conv = jnp.dot(wc, xb, preferred_element_type=jnp.float32) + bc  # [2C1, N]
        p = conv[:c1]          # static sublane slices on 8-row boundaries
        q = conv[c1:]
        h = p * jax.nn.sigmoid(q)                                        # [C1, N] f32 (GLU)

        # LayerNorm over the whole [n_vertex, C1] tile; two-pass centered stats.
        s = jnp.sum(jnp.sum(h, axis=1, keepdims=True), axis=0, keepdims=True)
        mean = s * inv_cnt
        hc = h - mean
        ss = jnp.sum(jnp.sum(hc * hc, axis=1, keepdims=True), axis=0, keepdims=True)
        var = ss * inv_cnt
        hn = (hc * jax.lax.rsqrt(var + 1e-5) * g + bln).astype(jnp.bfloat16)

        # fc1 -> ReLU -> fc2, all weights-on-left.
        z = jnp.dot(w1, hn, preferred_element_type=jnp.float32) + b1     # [C2, N]
        z = jnp.maximum(z, 0.0).astype(jnp.bfloat16)
        out = jnp.dot(w2, z, preferred_element_type=jnp.float32) + b2    # [Ce, N]

        # TODO(synk): at production n_vertex (N a multiple of 128) this store is
        # lane-dense; at N=16 the masked store is ~1 KB and negligible.
        o_ref[b] = out.astype(o_ref.dtype)


def _choose_batch_tile(B, *, per_batch_block_bytes, weight_bytes,
                       vmem_budget_bytes=None, num_tensorcores=None):
    """Pick the batch tile Bt (grid = (B // Bt,)).

    Default Bt = B (single grid step): on single-TensorCore parts (v5e/v6e)
    extra grid steps are a serial loop costing ~0.35 us each with zero gain.
    Split into 2 'parallel' steps only on 2-TC parts (v7x) AND when each
    half-step's data comfortably exceeds the per-step overhead.  A VMEM guard
    (double-buffered x/out blocks + resident weights) can shrink Bt further.
    """
    if vmem_budget_bytes is None:
        vmem_budget_bytes = 8 << 20            # safe under v5e's 16 MiB scoped default
        try:                                   # tighter on parts with less VMEM (v7x: 64 MiB)
            vmem_budget_bytes = min(
                vmem_budget_bytes,
                int(pltpu.get_tpu_info().vmem_capacity_bytes) // 8)
        except Exception:
            pass
    if num_tensorcores is None:
        num_tensorcores = 1
        try:
            kind = jax.devices()[0].device_kind.lower()
            if ("v7" in kind) or ("7x" in kind):
                num_tensorcores = 2
        except Exception:
            pass

    bt = B
    if (num_tensorcores >= 2 and B % 2 == 0
            and (B // 2) * per_batch_block_bytes >= (256 << 10)):
        bt = B // 2                            # megacore split only when work justifies it
    while bt > 1 and 2 * bt * per_batch_block_bytes + weight_bytes > vmem_budget_bytes:
        bt -= 1
        while B % bt:
            bt -= 1
    return bt


def prepare_params(torch_params, Ko):
    """One-time conversion of PyTorch-layout parameters into kernel operands.

    Call once at parameter-load time (outside the jitted forward) so these
    tiny preprocessing ops are not re-executed on every call.

      wc   : [2*C1, Cin, Ko]  Conv2d weight (trailing width-1 dim dropped)
      bc   : [2*C1]
      gamma/beta : [N, C1]    LayerNorm([n_vertex, channels[0]]) params
      w1   : [C2, C1], b1: [C2]   (torch nn.Linear layout)
      w2   : [Ce, C2], b2: [Ce]
    """
    wc, bc, gamma, beta, w1, b1, w2, b2 = torch_params
    co2, cin, ko = wc.shape
    n_vertex, c1 = gamma.shape
    assert ko == Ko
    # TODO(synk): only act_func='glu' with identity Align (last_block_channel ==
    # channels[0]) is implemented; other act_funcs / 1x1-conv Align not covered.
    assert co2 == 2 * c1 and cin == c1, (co2, cin, c1)
    kc = cin * Ko

    wc_flat = wc.reshape(co2, kc).astype(jnp.float32)
    # Fold the GLU residual x[:, c, Ko-1, :] (row c*Ko + Ko-1 of the flattened
    # input) into the "p" half of the conv weight:  Wp @ x + x_last == (Wp + S) @ x.
    # NOTE: valid only for the [B, Cin, Ko, N] -> [B, Cin*Ko, N] flattening
    # (channel-major, time-minor) used by output_block_forward.
    rows = jnp.arange(c1)
    wc_folded = wc_flat.at[rows, rows * Ko + (Ko - 1)].add(1.0)

    return dict(
        wc=wc_folded.astype(jnp.bfloat16),                 # [2*C1, KC]
        bc=bc.reshape(co2, 1).astype(jnp.float32),         # [2*C1, 1]
        gamma=jnp.transpose(gamma).astype(jnp.float32),    # [C1, N]
        beta=jnp.transpose(beta).astype(jnp.float32),      # [C1, N]
        w1=w1.astype(jnp.bfloat16),                        # [C2, C1]
        b1=b1.reshape(-1, 1).astype(jnp.float32),          # [C2, 1]
        w2=w2.astype(jnp.bfloat16),                        # [Ce, C2]
        b2=b2.reshape(-1, 1).astype(jnp.float32),          # [Ce, 1]
    )


def output_block_forward(x_nchw, kp, *, batch_tile=None):
    """x_nchw: [B, Cin, Ko, N] float32; kp from prepare_params. Returns [B, Ce, 1, N]."""
    B, Cin, Ko, N = x_nchw.shape
    KC = Cin * Ko
    C1 = kp["gamma"].shape[0]
    C2 = kp["w1"].shape[0]
    Ce = kp["w2"].shape[0]

    # [B, Cin, Ko, N] -> [B, Cin*Ko, N]: Cin and Ko are adjacent, so this is a
    # zero-cost view (no relayout, no extra HBM pass). bf16 cast happens in-kernel.
    x = x_nchw.reshape(B, KC, N)

    weight_bytes = sum(int(v.size) * v.dtype.itemsize for v in kp.values())
    if batch_tile is None:
        batch_tile = _choose_batch_tile(
            B,
            per_batch_block_bytes=(KC * N + Ce * N) * 4,
            weight_bytes=weight_bytes)
    bt = batch_tile
    assert B % bt == 0, (B, bt)
    grid = (B // bt,)

    out = pl.pallas_call(
        _output_block_kernel,
        out_shape=jax.ShapeDtypeStruct((B, Ce, N), jnp.float32),
        grid=grid,
        in_specs=[
            pl.BlockSpec((bt, KC, N), lambda g: (g, 0, 0)),   # x (batch tile, native view)
            pl.BlockSpec((2 * C1, KC), lambda g: (0, 0)),     # conv weight (residual folded)
            pl.BlockSpec((2 * C1, 1), lambda g: (0, 0)),      # conv bias
            pl.BlockSpec((C1, N), lambda g: (0, 0)),          # LayerNorm gamma (transposed)
            pl.BlockSpec((C1, N), lambda g: (0, 0)),          # LayerNorm beta
            pl.BlockSpec((C2, C1), lambda g: (0, 0)),         # fc1 weight
            pl.BlockSpec((C2, 1), lambda g: (0, 0)),          # fc1 bias
            pl.BlockSpec((Ce, C2), lambda g: (0, 0)),         # fc2 weight
            pl.BlockSpec((Ce, 1), lambda g: (0, 0)),          # fc2 bias
        ],
        out_specs=pl.BlockSpec((bt, Ce, N), lambda g: (g, 0, 0)),
        compiler_params=pltpu.CompilerParams(
            dimension_semantics=("parallel",)),  # no-op on 1-TC parts; shards on v7x
    )(x, kp["wc"], kp["bc"], kp["gamma"], kp["beta"],
      kp["w1"], kp["b1"], kp["w2"], kp["b2"])

    # [B, Ce, N] -> [B, Ce, 1, N]: free expand_dims (matches .permute(0, 3, 1, 2)).
    return out[:, :, None, :]


def reference_forward(x, torch_params, Ko):
    """Pure-JAX f32 reference mirroring the PyTorch module (act_func='glu')."""
    wc, bc, gamma, beta, w1, b1, w2, b2 = torch_params
    C1 = gamma.shape[1]
    conv = jnp.einsum('oit,bitn->bon', wc, x) + bc[None, :, None]     # [B, 2C1, N]
    res = x[:, :, Ko - 1, :]                                          # identity Align
    h = (conv[:, :C1] + res) * jax.nn.sigmoid(conv[:, C1:])           # GLU, [B, C1, N]
    hp = jnp.transpose(h, (0, 2, 1))                                  # [B, N, C1]
    mean = jnp.mean(hp, axis=(1, 2), keepdims=True)
    var = jnp.mean((hp - mean) ** 2, axis=(1, 2), keepdims=True)
    hn = (hp - mean) / jnp.sqrt(var + 1e-5) * gamma[None] + beta[None]
    z = jnp.maximum(hn @ w1.T + b1[None, None, :], 0.0)
    o = z @ w2.T + b2[None, None, :]                                  # [B, N, Ce]
    return jnp.transpose(o, (0, 2, 1))[:, :, None, :]                 # [B, Ce, 1, N]


if __name__ == "__main__":
    # Shapes implied by the module: Ko=4, last_block_channel = channels[0] = 32
    # (identity Align), channels = [32, 32], end_channel = 8, n_vertex = 16, B = 2.
    B, Cin, Ko, N = 2, 32, 4, 16
    C1, C2, Ce = 32, 32, 8

    key = jax.random.PRNGKey(0)
    keys = jax.random.split(key, 9)

    x = jax.random.normal(keys[0], (B, Cin, Ko, N), dtype=jnp.float32)

    # Parameters in native PyTorch layouts.
    wc = jax.random.normal(keys[1], (2 * C1, Cin, Ko), jnp.float32) * (1.0 / (Cin * Ko) ** 0.5)
    bc = jax.random.normal(keys[2], (2 * C1,), jnp.float32) * 0.05
    gamma = 1.0 + 0.1 * jax.random.normal(keys[3], (N, C1), jnp.float32)
    beta = 0.1 * jax.random.normal(keys[4], (N, C1), jnp.float32)
    w1 = jax.random.normal(keys[5], (C2, C1), jnp.float32) * (1.0 / C1 ** 0.5)
    b1 = jax.random.normal(keys[6], (C2,), jnp.float32) * 0.05
    w2 = jax.random.normal(keys[7], (Ce, C2), jnp.float32) * (1.0 / C2 ** 0.5)
    b2 = jax.random.normal(keys[8], (Ce,), jnp.float32) * 0.05

    torch_params = (wc, bc, gamma, beta, w1, b1, w2, b2)

    # One-time parameter preprocessing, hoisted out of the jitted forward path.
    kp = prepare_params(torch_params, Ko)

    fwd = jax.jit(output_block_forward)
    out = jax.block_until_ready(fwd(x, kp))
    assert out.shape == (B, Ce, 1, N), out.shape

    ref = reference_forward(x, torch_params, Ko)
    err = float(jnp.max(jnp.abs(out - ref)))
    # Tolerance accounts for bf16 matmul operands (f32 accumulation) vs. the
    # all-f32 reference; observed error is well inside this bound.
    assert jnp.allclose(out, ref, rtol=3e-2, atol=3e-2), err

    print("KERNEL_OK")
</pallas_src>

<mosaic_0001>
module attributes {stable_mosaic.version = 11 : i64} {
  func.func @_output_block_kernel(%arg0: i32, %arg1: memref<2x128x16xf32, #tpu.memory_space<vmem>>, %arg2: memref<64x128xbf16, #tpu.memory_space<vmem>>, %arg3: memref<64x1xf32, #tpu.memory_space<vmem>>, %arg4: memref<32x16xf32, #tpu.memory_space<vmem>>, %arg5: memref<32x16xf32, #tpu.memory_space<vmem>>, %arg6: memref<32x32xbf16, #tpu.memory_space<vmem>>, %arg7: memref<32x1xf32, #tpu.memory_space<vmem>>, %arg8: memref<8x32xbf16, #tpu.memory_space<vmem>>, %arg9: memref<8x1xf32, #tpu.memory_space<vmem>>, %arg10: memref<2x8x16xf32, #tpu.memory_space<vmem>>) attributes {dimension_semantics = [#tpu.dimension_semantics<parallel>], iteration_bounds = array<i64: 1>, scalar_prefetch = 0 : i64, scratch_operands = 0 : i64, tpu.core_type = #tpu.core_type<tc>, window_params = [{transform_indices = @transform_0, window_bounds = array<i64: 2, 128, 16>}, {pipeline_mode = #tpu.pipeline_mode<synchronous>, transform_indices = @transform_1, window_bounds = array<i64: 64, 128>}, {pipeline_mode = #tpu.pipeline_mode<synchronous>, transform_indices = @transform_2, window_bounds = array<i64: 64, 1>}, {pipeline_mode = #tpu.pipeline_mode<synchronous>, transform_indices = @transform_3, window_bounds = array<i64: 32, 16>}, {pipeline_mode = #tpu.pipeline_mode<synchronous>, transform_indices = @transform_4, window_bounds = array<i64: 32, 16>}, {pipeline_mode = #tpu.pipeline_mode<synchronous>, transform_indices = @transform_5, window_bounds = array<i64: 32, 32>}, {pipeline_mode = #tpu.pipeline_mode<synchronous>, transform_indices = @transform_6, window_bounds = array<i64: 32, 1>}, {pipeline_mode = #tpu.pipeline_mode<synchronous>, transform_indices = @transform_7, window_bounds = array<i64: 8, 32>}, {pipeline_mode = #tpu.pipeline_mode<synchronous>, transform_indices = @transform_8, window_bounds = array<i64: 8, 1>}, {transform_indices = @transform_9, window_bounds = array<i64: 2, 8, 16>}]} {
    %c0 = arith.constant 0 : index
    %c0_0 = arith.constant 0 : index
    %0 = vector.load %arg2[%c0, %c0_0] : memref<64x128xbf16, #tpu.memory_space<vmem>>, vector<64x128xbf16>
    %c0_1 = arith.constant 0 : index
    %c0_2 = arith.constant 0 : index
    %1 = vector.load %arg3[%c0_1, %c0_2] : memref<64x1xf32, #tpu.memory_space<vmem>>, vector<64x1xf32>
    %c0_3 = arith.constant 0 : index
    %c0_4 = arith.constant 0 : index
    %2 = vector.load %arg4[%c0_3, %c0_4] : memref<32x16xf32, #tpu.memory_space<vmem>>, vector<32x16xf32>
    %c0_5 = arith.constant 0 : index
    %c0_6 = arith.constant 0 : index
    %3 = vector.load %arg5[%c0_5, %c0_6] : memref<32x16xf32, #tpu.memory_space<vmem>>, vector<32x16xf32>
    %c0_7 = arith.constant 0 : index
    %c0_8 = arith.constant 0 : index
    %4 = vector.load %arg6[%c0_7, %c0_8] : memref<32x32xbf16, #tpu.memory_space<vmem>>, vector<32x32xbf16>
    %c0_9 = arith.constant 0 : index
    %c0_10 = arith.constant 0 : index
    %5 = vector.load %arg7[%c0_9, %c0_10] : memref<32x1xf32, #tpu.memory_space<vmem>>, vector<32x1xf32>
    %c0_11 = arith.constant 0 : index
    %c0_12 = arith.constant 0 : index
    %6 = vector.load %arg8[%c0_11, %c0_12] : memref<8x32xbf16, #tpu.memory_space<vmem>>, vector<8x32xbf16>
    %c0_13 = arith.constant 0 : index
    %c0_14 = arith.constant 0 : index
    %7 = vector.load %arg9[%c0_13, %c0_14] : memref<8x1xf32, #tpu.memory_space<vmem>>, vector<8x1xf32>
    %c0_15 = arith.constant 0 : index
    %c0_16 = arith.constant 0 : index
    %c0_17 = arith.constant 0 : index
    %8 = vector.load %arg1[%c0_15, %c0_16, %c0_17] : memref<2x128x16xf32, #tpu.memory_space<vmem>>, vector<1x128x16xf32>
    %9 = vector.shape_cast %8 : vector<1x128x16xf32> to vector<128x16xf32>
    %10 = arith.truncf %9 : vector<128x16xf32> to vector<128x16xbf16>
    %cst = arith.constant dense<0.000000e+00> : vector<64x16xf32>
    %11 = tpu.matmul %0, %10, %cst {dimension_numbers = #tpu.dot_dimension_numbers<[1], [0], [0], [1], [0, 0, 1, 1], [], []>} : vector<64x128xbf16>, vector<128x16xbf16>, vector<64x16xf32> -> vector<64x16xf32>
    %12 = vector.broadcast %1 : vector<64x1xf32> to vector<64x16xf32>
    %13 = arith.addf %11, %12 : vector<64x16xf32>
    %14 = vector.extract_strided_slice %13 {offsets = [0, 0], sizes = [32, 16], strides = [1, 1]} : vector<64x16xf32> to vector<32x16xf32>
    %15 = vector.extract_strided_slice %13 {offsets = [32, 0], sizes = [32, 16], strides = [1, 1]} : vector<64x16xf32> to vector<32x16xf32>
    %16 = arith.negf %15 : vector<32x16xf32>
    %17 = math.exp %16 : vector<32x16xf32>
    %cst_18 = arith.constant 1.000000e+00 : f32
    %18 = vector.broadcast %cst_18 : f32 to vector<32x16xf32>
    %19 = arith.addf %18, %17 : vector<32x16xf32>
    %20 = arith.divf %18, %19 : vector<32x16xf32>
    %21 = arith.mulf %14, %20 : vector<32x16xf32>
    %cst_19 = arith.constant dense<0.000000e+00> : vector<32xf32>
    %22 = vector.multi_reduction <add>, %21, %cst_19 [1] : vector<32x16xf32> to vector<32xf32>
    %23 = vector.shape_cast %22 : vector<32xf32> to vector<32x1xf32>
    %cst_20 = arith.constant dense<0.000000e+00> : vector<1xf32>
    %24 = vector.multi_reduction <add>, %23, %cst_20 [0] : vector<32x1xf32> to vector<1xf32>
    %25 = vector.shape_cast %24 : vector<1xf32> to vector<1x1xf32>
    %cst_21 = arith.constant 0.001953125 : f32
    %26 = vector.broadcast %cst_21 : f32 to vector<1x1xf32>
    %27 = arith.mulf %25, %26 : vector<1x1xf32>
    %28 = vector.broadcast %27 : vector<1x1xf32> to vector<32x16xf32>
    %29 = arith.subf %21, %28 : vector<32x16xf32>
    %30 = arith.mulf %29, %29 : vector<32x16xf32>
    %cst_22 = arith.constant dense<0.000000e+00> : vector<32xf32>
    %31 = vector.multi_reduction <add>, %30, %cst_22 [1] : vector<32x16xf32> to vector<32xf32>
    %32 = vector.shape_cast %31 : vector<32xf32> to vector<32x1xf32>
    %cst_23 = arith.constant dense<0.000000e+00> : vector<1xf32>
    %33 = vector.multi_reduction <add>, %32, %cst_23 [0] : vector<32x1xf32> to vector<1xf32>
    %34 = vector.shape_cast %33 : vector<1xf32> to vector<1x1xf32>
    %cst_24 = arith.constant 0.001953125 : f32
    %35 = vector.broadcast %cst_24 : f32 to vector<1x1xf32>
    %36 = arith.mulf %34, %35 : vector<1x1xf32>
    %cst_25 = arith.constant 9.99999974E-6 : f32
    %37 = vector.broadcast %cst_25 : f32 to vector<1x1xf32>
    %38 = arith.addf %36, %37 : vector<1x1xf32>
    %39 = math.rsqrt %38 : vector<1x1xf32>
    %40 = vector.broadcast %39 : vector<1x1xf32> to vector<32x16xf32>
    %41 = arith.mulf %29, %40 : vector<32x16xf32>
    %42 = arith.mulf %41, %2 : vector<32x16xf32>
    %43 = arith.addf %42, %3 : vector<32x16xf32>
    %44 = arith.truncf %43 : vector<32x16xf32> to vector<32x16xbf16>
    %cst_26 = arith.constant dense<0.000000e+00> : vector<32x16xf32>
    %45 = tpu.matmul %4, %44, %cst_26 {dimension_numbers = #tpu.dot_dimension_numbers<[1], [0], [0], [1], [0, 0, 1, 1], [], []>} : vector<32x32xbf16>, vector<32x16xbf16>, vector<32x16xf32> -> vector<32x16xf32>
    %46 = vector.broadcast %5 : vector<32x1xf32> to vector<32x16xf32>
    %47 = arith.addf %45, %46 : vector<32x16xf32>
    %cst_27 = arith.constant 0.000000e+00 : f32
    %48 = vector.broadcast %cst_27 : f32 to vector<32x16xf32>
    %49 = arith.maximumf %47, %48 : vector<32x16xf32>
    %50 = arith.truncf %49 : vector<32x16xf32> to vector<32x16xbf16>
    %cst_28 = arith.constant dense<0.000000e+00> : vector<8x16xf32>
    %51 = tpu.matmul %6, %50, %cst_28 {dimension_numbers = #tpu.dot_dimension_numbers<[1], [0], [0], [1], [0, 0, 1, 1], [], []>} : vector<8x32xbf16>, vector<32x16xbf16>, vector<8x16xf32> -> vector<8x16xf32>
    %52 = vector.broadcast %7 : vector<8x1xf32> to vector<8x16xf32>
    %53 = arith.addf %51, %52 : vector<8x16xf32>
    %c0_29 = arith.constant 0 : index
    %c0_30 = arith.constant 0 : index
    %c0_31 = arith.constant 0 : index
    %54 = vector.load %arg10[%c0_29, %c0_30, %c0_31] : memref<2x8x16xf32, #tpu.memory_space<vmem>>, vector<1x8x16xf32>
    %55 = vector.shape_cast %54 : vector<1x8x16xf32> to vector<8x16xf32>
    %56 = vector.shape_cast %53 : vector<8x16xf32> to vector<1x8x16xf32>
    tpu.vector_store %arg10[%c0_29, %c0_30, %c0_31], %56 {strides = array<i32>} : memref<2x8x16xf32, #tpu.memory_space<vmem>>, vector<1x8x16xf32>,
    %c1 = arith.constant 1 : index
    %c0_32 = arith.constant 0 : index
    %c0_33 = arith.constant 0 : index
    %57 = vector.load %arg1[%c1, %c0_32, %c0_33] : memref<2x128x16xf32, #tpu.memory_space<vmem>>, vector<1x128x16xf32>
    %58 = vector.shape_cast %57 : vector<1x128x16xf32> to vector<128x16xf32>
    %59 = arith.truncf %58 : vector<128x16xf32> to vector<128x16xbf16>
    %cst_34 = arith.constant dense<0.000000e+00> : vector<64x16xf32>
    %60 = tpu.matmul %0, %59, %cst_34 {dimension_numbers = #tpu.dot_dimension_numbers<[1], [0], [0], [1], [0, 0, 1, 1], [], []>} : vector<64x128xbf16>, vector<128x16xbf16>, vector<64x16xf32> -> vector<64x16xf32>
    %61 = vector.broadcast %1 : vector<64x1xf32> to vector<64x16xf32>
    %62 = arith.addf %60, %61 : vector<64x16xf32>
    %63 = vector.extract_strided_slice %62 {offsets = [0, 0], sizes = [32, 16], strides = [1, 1]} : vector<64x16xf32> to vector<32x16xf32>
    %64 = vector.extract_strided_slice %62 {offsets = [32, 0], sizes = [32, 16], strides = [1, 1]} : vector<64x16xf32> to vector<32x16xf32>
    %65 = arith.negf %64 : vector<32x16xf32>
    %66 = math.exp %65 : vector<32x16xf32>
    %cst_35 = arith.constant 1.000000e+00 : f32
    %67 = vector.broadcast %cst_35 : f32 to vector<32x16xf32>
    %68 = arith.addf %67, %66 : vector<32x16xf32>
    %69 = arith.divf %67, %68 : vector<32x16xf32>
    %70 = arith.mulf %63, %69 : vector<32x16xf32>
    %cst_36 = arith.constant dense<0.000000e+00> : vector<32xf32>
    %71 = vector.multi_reduction <add>, %70, %cst_36 [1] : vector<32x16xf32> to vector<32xf32>
    %72 = vector.shape_cast %71 : vector<32xf32> to vector<32x1xf32>
    %cst_37 = arith.constant dense<0.000000e+00> : vector<1xf32>
    %73 = vector.multi_reduction <add>, %72, %cst_37 [0] : vector<32x1xf32> to vector<1xf32>
    %74 = vector.shape_cast %73 : vector<1xf32> to vector<1x1xf32>
    %cst_38 = arith.constant 0.001953125 : f32
    %75 = vector.broadcast %cst_38 : f32 to vector<1x1xf32>
    %76 = arith.mulf %74, %75 : vector<1x1xf32>
    %77 = vector.broadcast %76 : vector<1x1xf32> to vector<32x16xf32>
    %78 = arith.subf %70, %77 : vector<32x16xf32>
    %79 = arith.mulf %78, %78 : vector<32x16xf32>
    %cst_39 = arith.constant dense<0.000000e+00> : vector<32xf32>
    %80 = vector.multi_reduction <add>, %79, %cst_39 [1] : vector<32x16xf32> to vector<32xf32>
    %81 = vector.shape_cast %80 : vector<32xf32> to vector<32x1xf32>
    %cst_40 = arith.constant dense<0.000000e+00> : vector<1xf32>
    %82 = vector.multi_reduction <add>, %81, %cst_40 [0] : vector<32x1xf32> to vector<1xf32>
    %83 = vector.shape_cast %82 : vector<1xf32> to vector<1x1xf32>
    %cst_41 = arith.constant 0.001953125 : f32
    %84 = vector.broadcast %cst_41 : f32 to vector<1x1xf32>
    %85 = arith.mulf %83, %84 : vector<1x1xf32>
    %cst_42 = arith.constant 9.99999974E-6 : f32
    %86 = vector.broadcast %cst_42 : f32 to vector<1x1xf32>
    %87 = arith.addf %85, %86 : vector<1x1xf32>
    %88 = math.rsqrt %87 : vector<1x1xf32>
    %89 = vector.broadcast %88 : vector<1x1xf32> to vector<32x16xf32>
    %90 = arith.mulf %78, %89 : vector<32x16xf32>
    %91 = arith.mulf %90, %2 : vector<32x16xf32>
    %92 = arith.addf %91, %3 : vector<32x16xf32>
    %93 = arith.truncf %92 : vector<32x16xf32> to vector<32x16xbf16>
    %cst_43 = arith.constant dense<0.000000e+00> : vector<32x16xf32>
    %94 = tpu.matmul %4, %93, %cst_43 {dimension_numbers = #tpu.dot_dimension_numbers<[1], [0], [0], [1], [0, 0, 1, 1], [], []>} : vector<32x32xbf16>, vector<32x16xbf16>, vector<32x16xf32> -> vector<32x16xf32>
    %95 = vector.broadcast %5 : vector<32x1xf32> to vector<32x16xf32>
    %96 = arith.addf %94, %95 : vector<32x16xf32>
    %cst_44 = arith.constant 0.000000e+00 : f32
    %97 = vector.broadcast %cst_44 : f32 to vector<32x16xf32>
    %98 = arith.maximumf %96, %97 : vector<32x16xf32>
    %99 = arith.truncf %98 : vector<32x16xf32> to vector<32x16xbf16>
    %cst_45 = arith.constant dense<0.000000e+00> : vector<8x16xf32>
    %100 = tpu.matmul %6, %99, %cst_45 {dimension_numbers = #tpu.dot_dimension_numbers<[1], [0], [0], [1], [0, 0, 1, 1], [], []>} : vector<8x32xbf16>, vector<32x16xbf16>, vector<8x16xf32> -> vector<8x16xf32>
    %101 = vector.broadcast %7 : vector<8x1xf32> to vector<8x16xf32>
    %102 = arith.addf %100, %101 : vector<8x16xf32>
    %c1_46 = arith.constant 1 : index
    %c0_47 = arith.constant 0 : index
    %c0_48 = arith.constant 0 : index
    %103 = vector.load %arg10[%c1_46, %c0_47, %c0_48] : memref<2x8x16xf32, #tpu.memory_space<vmem>>, vector<1x8x16xf32>
    %104 = vector.shape_cast %103 : vector<1x8x16xf32> to vector<8x16xf32>
    %105 = vector.shape_cast %102 : vector<8x16xf32> to vector<1x8x16xf32>
    tpu.vector_store %arg10[%c1_46, %c0_47, %c0_48], %105 {strides = array<i32>} : memref<2x8x16xf32, #tpu.memory_space<vmem>>, vector<1x8x16xf32>,
    return
  }
  func.func @transform_0(%arg0: i32) -> (i32, i32, i32) {
    %c0_i32 = arith.constant 0 : i32
    %c0_i32_0 = arith.constant 0 : i32
    %c0_i32_1 = arith.constant 0 : i32
    return %arg0, %c0_i32, %c0_i32_0 : i32, i32, i32
  }
  func.func @transform_1(%arg0: i32) -> (i32, i32) {
    %c0_i32 = arith.constant 0 : i32
    %c0_i32_0 = arith.constant 0 : i32
    %c0_i32_1 = arith.constant 0 : i32
    return %c0_i32, %c0_i32_0 : i32, i32
  }
  func.func @transform_2(%arg0: i32) -> (i32, i32) {
    %c0_i32 = arith.constant 0 : i32
    %c0_i32_0 = arith.constant 0 : i32
    %c0_i32_1 = arith.constant 0 : i32
    return %c0_i32, %c0_i32_0 : i32, i32
  }
  func.func @transform_3(%arg0: i32) -> (i32, i32) {
    %c0_i32 = arith.constant 0 : i32
    %c0_i32_0 = arith.constant 0 : i32
    %c0_i32_1 = arith.constant 0 : i32
    return %c0_i32, %c0_i32_0 : i32, i32
  }
  func.func @transform_4(%arg0: i32) -> (i32, i32) {
    %c0_i32 = arith.constant 0 : i32
    %c0_i32_0 = arith.constant 0 : i32
    %c0_i32_1 = arith.constant 0 : i32
    return %c0_i32, %c0_i32_0 : i32, i32
  }
  func.func @transform_5(%arg0: i32) -> (i32, i32) {
    %c0_i32 = arith.constant 0 : i32
    %c0_i32_0 = arith.constant 0 : i32
    %c0_i32_1 = arith.constant 0 : i32
    return %c0_i32, %c0_i32_0 : i32, i32
  }
  func.func @transform_6(%arg0: i32) -> (i32, i32) {
    %c0_i32 = arith.constant 0 : i32
    %c0_i32_0 = arith.constant 0 : i32
    %c0_i32_1 = arith.constant 0 : i32
    return %c0_i32, %c0_i32_0 : i32, i32
  }
  func.func @transform_7(%arg0: i32) -> (i32, i32) {
    %c0_i32 = arith.constant 0 : i32
    %c0_i32_0 = arith.constant 0 : i32
    %c0_i32_1 = arith.constant 0 : i32
    return %c0_i32, %c0_i32_0 : i32, i32
  }
  func.func @transform_8(%arg0: i32) -> (i32, i32) {
    %c0_i32 = arith.constant 0 : i32
    %c0_i32_0 = arith.constant 0 : i32
    %c0_i32_1 = arith.constant 0 : i32
    return %c0_i32, %c0_i32_0 : i32, i32
  }
  func.func @transform_9(%arg0: i32) -> (i32, i32, i32) {
    %c0_i32 = arith.constant 0 : i32
    %c0_i32_0 = arith.constant 0 : i32
    %c0_i32_1 = arith.constant 0 : i32
    return %arg0, %c0_i32, %c0_i32_0 : i32, i32, i32
  }
}

</mosaic_0001>

<bundles_post_ra>
// kernel: output_block_forward.1
= control target key start
LH: loop header
LB: loop body
LE: loop exit
PB: predicated region body
PF: predicated region fallthrough
CT: control target
= control target key end

     0   :  { %v825_v14 = vmov 0   ;;  %s1267_s0 = inlined_call_operand.vmem [shape: f32[2,128,16], index: 0, kind: input, shape index: {}]   ;;  %s1268_s1 = inlined_call_operand.vmem [shape: bf16[64,128], index: 1, kind: input, shape index: {}]   ;;  %s1269_s2 = inlined_call_operand.vmem [shape: f32[64,1], index: 2, kind: input, shape index: {}]   ;;  %s1270_s3 = inlined_call_operand.vmem [shape: f32[32,16], index: 3, kind: input, shape index: {}]   ;;  %s1271_s4 = inlined_call_operand.vmem [shape: f32[32,16], index: 4, kind: input, shape index: {}]   ;;  %s1272_s5 = inlined_call_operand.vmem [shape: bf16[32,32], index: 5, kind: input, shape index: {}]   ;;  %s1273_s6 = inlined_call_operand.vmem [shape: f32[32,1], index: 6, kind: input, shape index: {}]   ;;  %s1274_s7 = inlined_call_operand.vmem [shape: bf16[8,32], index: 7, kind: input, shape index: {}]   ;;  %s1275_s8 = inlined_call_operand.vmem [shape: f32[8,1], index: 8, kind: input, shape index: {}]   ;;  %s1276_s9 = inlined_call_operand.hbm [shape: f32[2,8,16], index: 9, kind: output, shape index: {}]  }
   0x1   :  { %v82_v0 = vld [vmem:[%s1267_s0 + $0x70] sm:$0xff]  ;;  %v83_v1 = vld [vmem:[%s1267_s0 + $0x78] sm:$0xff]  ;;  %v80_v5 = vld [vmem:[%s1267_s0 + $0x60] sm:$0xff]  ;;  %760 = vset.pattern.permute.xlu0 %v825_v14  ;;  %761 = vset.pattern.permute.xlu1 %v825_v14 }
   0x2   :  { %v741_v2 = vld [vmem:[%s1267_s0 + $0xf0] sm:$0xff]  ;;  %v91_v3 = vpack.c.bf16 %v83_v1, %v82_v0  ;;  %v742_v4 = vld [vmem:[%s1267_s0 + $0xf8] sm:$0xff]  ;;  %v81_v6 = vld [vmem:[%s1267_s0 + $0x68] sm:$0xff]  ;;  %762 = vset.pattern.permute.xlu2 %v825_v14 }
   0x3   :  { %v451_v7 = vpack.c.bf16 %v742_v4, %v741_v2  ;;  %v739_v8 = vld [vmem:[%s1267_s0 + $0xe0] sm:$0xff]  ;;  %v740_v9 = vld [vmem:[%s1267_s0 + $0xe8] sm:$0xff]  ;;  %v90_v10 = vpack.c.bf16 %v81_v6, %v80_v5  ;;  %v78_v12 = vld [vmem:[%s1267_s0 + $0x50] sm:$0xff] }
   0x4   :  { %156 = vmatpush.bf16.msra.mxu0 %v91_v3  ;;  %v450_v11 = vpack.c.bf16 %v740_v9, %v739_v8  ;;  %v79_v13 = vld [vmem:[%s1267_s0 + $0x58] sm:$0xff]  ;;  %v737_v15 = vld [vmem:[%s1267_s0 + $0xd0] sm:$0xff]  ;;  %v76_v19 = vld [vmem:[%s1267_s0 + $0x40] sm:$0xff] }
   0x5   :  { %452 = vmatpush.bf16.msra.mxu3 %v451_v7  ;;  %v738_v16 = vld [vmem:[%s1267_s0 + $0xd8] sm:$0xff]  ;;  %v89_v17 = vpack.c.bf16 %v79_v13, %v78_v12  ;;  %v77_v20 = vld [vmem:[%s1267_s0 + $0x48] sm:$0xff]  ;;  %v735_v21 = vld [vmem:[%s1267_s0 + $0xc0] sm:$0xff] }
   0x6   :  { %v449_v18 = vpack.c.bf16 %v738_v16, %v737_v15  ;;  %v736_v22 = vld [vmem:[%s1267_s0 + $0xc8] sm:$0xff]  ;;  %v88_v23 = vpack.c.bf16 %v77_v20, %v76_v19  ;;  %v46_v24 = vld [vmem:[%s1269_s2 + $0x20] sm:$0xff] }
   0x8   :  { %157 = vmatpush.bf16.msra.mxu0 %v90_v10 }
   0x9   :  { %453 = vmatpush.bf16.msra.mxu3 %v450_v11 }
   0xc   :  { %158 = vmatpush.bf16.msra.mxu0 %v89_v17 }
   0xd   :  { %14 = vsyncpa [#allocation3], 0  ;;  %454 = vmatpush.bf16.msra.mxu3 %v449_v18  ;;  %v448_v25 = vpack.c.bf16 %v736_v22, %v735_v21  ;;  %v74_v26 = vld [vmem:[%s1267_s0 + $0x30] sm:$0xff]  ;;  %v75_v27 = vld [vmem:[%s1267_s0 + $0x38] sm:$0xff]  ;;  %114 = vperm.xlu0 %760, %v46_v24   ;;  %vm265_vm3 = vcmask 130048   ;;  %s684_s16 = sshll.u32 %s1276_s9, 4  ;;  %s685_s16 = int_to_ptr.hbm [resolvable:$true] %s684_s16 }
   0xe   :  { %v733_v28 = vld [vmem:[%s1267_s0 + $0xb0] sm:$0xff]  ;;  %v734_v29 = vld [vmem:[%s1267_s0 + $0xb8] sm:$0xff]  ;;  %v87_v30 = vpack.c.bf16 %v75_v27, %v74_v26  ;;  %v72_v32 = vld [vmem:[%s1267_s0 + $0x20] sm:$0xff]  ;;  %s827_s17 = smov 128   ;;  %s828_s18 = smov 8  }
   0xf   :  { %v447_v31 = vpack.c.bf16 %v734_v29, %v733_v28  ;;  %v73_v33 = vld [vmem:[%s1267_s0 + $0x28] sm:$0xff]  ;;  %v731_v34 = vld [vmem:[%s1267_s0 + $0xa0] sm:$0xff]  ;;  %v48_v37 = vld [vmem:[%s1269_s2 + $0x30] sm:$0xff] }
  0x10   :  { %159 = vmatpush.bf16.msra.mxu0 %v88_v23  ;;  %v732_v35 = vld [vmem:[%s1267_s0 + $0xa8] sm:$0xff]  ;;  %v86_v36 = vpack.c.bf16 %v73_v33, %v72_v32  ;;  %v70_v40 = vld [vmem:[%s1267_s0 + $0x10] sm:$0xff]  ;;  %v71_v41 = vld [vmem:[%s1267_s0 + $0x18] sm:$0xff]  ;;  %124 = vperm.xlu1 %761, %v48_v37  }
  0x11   :  { %455 = vmatpush.bf16.msra.mxu3 %v448_v25  ;;  %v47_v38 = vld [vmem:[%s1269_s2 + $0x28] sm:$0xff]  ;;  %v446_v39 = vpack.c.bf16 %v732_v35, %v731_v34  ;;  %v729_v42 = vld [vmem:[%s1267_s0 + $0x90] sm:$0xff]  ;;  %v730_v43 = vld [vmem:[%s1267_s0 + $0x98] sm:$0xff]  ;;  %v85_v44 = vpack.c.bf16 %v71_v41, %v70_v40 }
  0x12   :  { %v445_v45 = vpack.c.bf16 %v730_v43, %v729_v42  ;;  %v68_v46 = vld [vmem:[%s1267_s0] sm:$0xff]  ;;  %v69_v47 = vld [vmem:[%s1267_s0 + $0x8] sm:$0xff]  ;;  %v49_v50 = vld [vmem:[%s1269_s2 + $0x38] sm:$0xff] }
  0x13   :  { %v727_v48 = vld [vmem:[%s1267_s0 + $0x80] sm:$0xff]  ;;  %v728_v49 = vld [vmem:[%s1267_s0 + $0x88] sm:$0xff]  ;;  %v44_v51 = vld [vmem:[%s1269_s2 + $0x10] sm:$0xff]  ;;  %v84_v52 = vpack.c.bf16 %v69_v47, %v68_v46 }
  0x14   :  { %160 = vmatpush.bf16.msra.mxu0 %v87_v30  ;;  %v444_v53 = vpack.c.bf16 %v728_v49, %v727_v48  ;;  %v750_v54 = vld [vmem:[%s1268_s1] sm:$0xff]  ;;  %v45_v55 = vld [vmem:[%s1269_s2 + $0x18] sm:$0xff]  ;;  %v43_v57 = vld [vmem:[%s1269_s2 + $0x8] sm:$0xff] }
  0x15   :  { %456 = vmatpush.bf16.msra.mxu3 %v447_v31  ;;  %119 = vperm.xlu0 %760, %v47_v38   ;;  %v42_v56 = vld [vmem:[%s1269_s2] sm:$0xff]  ;;  %v751_v58 = vld [vmem:[%s1268_s1 + $0x8] sm:$0xff]  ;;  %v752_v59 = vld [vmem:[%s1268_s1 + $0x10] sm:$0xff] }
  0x16   :  { %94 = vperm.xlu2 %762, %v42_v56   ;;  %v753_v60 = vld [vmem:[%s1268_s1 + $0x18] sm:$0xff] }
  0x18   :  { %161 = vmatpush.bf16.msra.mxu0 %v86_v36  ;;  %129 = vperm.xlu1 %761, %v49_v50  }
  0x19   :  { %457 = vmatpush.bf16.msra.mxu3 %v446_v39 }
  0x1c   :  { %162 = vmatpush.bf16.msra.mxu0 %v85_v44 }
  0x1d   :  { %458 = vmatpush.bf16.msra.mxu3 %v445_v45  ;;  %104 = vperm.xlu0 %760, %v44_v51  }
  0x1e   :  { %99 = vperm.xlu2 %762, %v43_v57  }
  0x20   :  { %163 = vmatpush.bf16.msra.mxu0 %v84_v52  ;;  %109 = vperm.xlu1 %761, %v45_v55  }
  0x21   :  { %459 = vmatpush.bf16.msra.mxu3 %v444_v53 }
  0x23   :  { %164 = vmatmul.bf16.vlgmr.msra.gmra.mxu0 %v750_v54 }
  0x24   :  { %460 = vmatmul.bf16.vlgmr.msra.gmra.mxu3 %v750_v54 }
  0x33   :  { %169 = vmatmul.bf16.gmra.mxu0 %v751_v58 }
  0x34   :  { %465 = vmatmul.bf16.gmra.mxu3 %v751_v58 }
  0x43   :  { %174 = vmatmul.bf16.gmra.mxu0 %v752_v59 }
  0x44   :  { %470 = vmatmul.bf16.gmra.mxu3 %v752_v59 }
  0x53   :  { %179 = vmatmul.bf16.gmra.mxu0 %v753_v60 }
  0x54   :  { %475 = vmatmul.bf16.gmra.mxu3 %v753_v60 }
  0x70   :  { %v95_v62 = vpop.permute.xlu2 %94 }
  0x78   :  { %v100_v56 = vpop.permute.xlu2 %99 }
  0x7f   :  { %v115_v6 = vpop.permute.xlu0 %114 }
  0x82   :  { %v1025_v20 = vpop.permute.xlu1 %124 }
  0x87   :  { %v120_v12 = vpop.permute.xlu0 %119 }
  0x8a   :  { %v1031_v34 = vpop.permute.xlu1 %129 }
  0xa0   :  { %v165_v61 = vpop.f32.mrf.mxu0 }
  0xa1   :  { %v166_v46 = vadd.f32 %v165_v61, %v95_v62 }
  0xa7   :  { %v461_v63 = vpop.f32.mrf.mxu3 }
  0xa8   :  { %v1011_v0 = vadd.f32 %v461_v63, %v95_v62  ;;  %v1013_v1 = vpop.f32.mrf.mxu0 }
  0xaf   :  { %v1015_v2 = vpop.f32.mrf.mxu3 }
  0xb0   :  { %v1017_v3 = vpop.f32.mrf.mxu0 }
  0xb7   :  { %v1019_v4 = vpop.f32.mrf.mxu3 }
  0xb8   :  { %v1021_v5 = vpop.f32.mrf.mxu0 }
  0xbf   :  { %v1023_v7 = vpop.f32.mrf.mxu3 }
  0xc0   :  { %v175_v8 = vpop.f32.mrf.mxu0 }
  0xc1   :  { %v176_v9 = vadd.f32 %v175_v8, %v115_v6 }
  0xc3   :  { %v712_v10 = vmul.f32 -1.442695, %v176_v9 }
  0xc5   :  { %763 = vpow2.f32 %v712_v10 }
  0xc7   :  { %v471_v11 = vpop.f32.mrf.mxu3 }
  0xc8   :  { %v472_v13 = vadd.f32 %v471_v11, %v115_v6  ;;  %v177_v14 = vpop.f32.mrf.mxu0  ;;  %v168_v6 = vadd.f32 %v1013_v1, %v100_v56 }
  0xc9   :  { %v178_v15 = vadd.f32 %v177_v14, %v120_v12 }
  0xca   :  { %v743_v16 = vmul.f32 -1.442695, %v472_v13 }
  0xcb   :  { %v764_v17 = vpop.eup %763  ;;  %v713_v18 = vmul.f32 -1.442695, %v178_v15 }
  0xcc   :  { %v197_v19 = vadd.f32 1.0, %v764_v17  ;;  %765 = vpow2.f32 %v743_v16 }
  0xcd   :  { %767 = vpow2.f32 %v713_v18 }
  0xce   :  { %769 = vrcp.f32 %v197_v19  ;;  %v212_v36 = vand.u32 2147483648, %v197_v19  ;;  %v210_v39 = vand.u32 2147483647, %v197_v19  ;;  %vm206_vm1 = vweird.f32 %v197_v19 }
  0xcf   :  { %v473_v21 = vpop.f32.mrf.mxu3 }
  0xd0   :  { %v474_v22 = vadd.f32 %v473_v21, %v120_v12  ;;  %v180_v23 = vpop.f32.mrf.mxu0  ;;  %v213_v47 = vor.u32 1.1754944e-38, %v212_v36  ;;  %vm211_vm4 = vcmp.eq.f32.partialorder %v210_v39, 8.507059e+37  ;;  %v1083_v39 = vpop.permute.xlu0 %104 }
  0xd1   :  { %v181_v24 = vadd.f32 %v180_v23, %v1025_v20 }
  0xd2   :  { %v766_v25 = vpop.eup %765  ;;  %v744_v26 = vmul.f32 -1.442695, %v474_v22 }
  0xd3   :  { %v768_v27 = vpop.eup %767  ;;  %v1028_v28 = vadd.f32 1.0, %v766_v25  ;;  %v714_v29 = vmul.f32 -1.442695, %v181_v24 }
  0xd4   :  { %v770_v30 = vpop.eup %769  ;;  %v198_v31 = vadd.f32 1.0, %v768_v27  ;;  %771 = vpow2.f32 %v744_v26 }
  0xd5   :  { %773 = vrcp.f32 %v1028_v28  ;;  %v202_v32 = vmul.f32 %v770_v30, %v197_v19  ;;  %vm207_vm0 = vweird.f32 %v770_v30  ;;  %v506_v62 = vand.u32 2147483647, %v1028_v28 }
  0xd6   :  { %775 = vrcp.f32 %v198_v31  ;;  %vm208_vm2 = vmor %vm206_vm1, %vm207_vm0  ;;  %v227_v57 = vand.u32 2147483648, %v198_v31  ;;  %v225_v60 = vand.u32 2147483647, %v198_v31  ;;  %vm221_vm6 = vweird.f32 %v198_v31 }
  0xd7   :  { %777 = vpow2.f32 %v714_v29  ;;  %v203_v33 = vsub.f32 1.0, %v202_v32  ;;  %vm502_vm7 = vweird.f32 %v1028_v28  ;;  %v508_v13 = vand.u32 2147483648, %v1028_v28 }
  0xd8   :  { %v182_v35 = vpop.f32.mrf.mxu0  ;;  %v228_v10 = vor.u32 1.1754944e-38, %v227_v57  ;;  %vm226_vm9 = vcmp.eq.f32.partialorder %v225_v60, 8.507059e+37  ;;  %vm1058_vm11 = vcmp.eq.f32.partialorder %v506_v62, 8.507059e+37  ;;  %v476_v62 = vpop.f32.mrf.mxu3 }
  0xd9   :  { %v183_v37 = vadd.f32 %v182_v35, %v1031_v34  ;;  %v204_v38 = vmul.f32 %v770_v30, %v203_v33  ;;  %v509_v26 = vor.u32 1.1754944e-38, %v508_v13 }
  0xda   :  { %v772_v40 = vpop.eup %771 }
  0xdb   :  { %v1034_v41 = vpop.eup %773  ;;  %v1036_v42 = vadd.f32 1.0, %v772_v40  ;;  %v715_v43 = vmul.f32 -1.442695, %v183_v37  ;;  %v205_v44 = vadd.f32 %v770_v30, %v204_v38  ;;  %v464_v38 = vadd.f32 %v1015_v2, %v100_v56 }
  0xdc   :  { %v776_v45 = vpop.eup %775  ;;  %v498_v53 = vmul.f32 %v1034_v41, %v1028_v28  ;;  %vm503_vm10 = vweird.f32 %v1034_v41 }
  0xdd   :  { %v778_v48 = vpop.eup %777  ;;  %779 = vrcp.f32 %v1036_v42  ;;  %v209_v49 = vsel %vm208_vm2, %v770_v30, %v205_v44  ;;  %v217_v50 = vmul.f32 %v776_v45, %v198_v31  ;;  %vm222_vm5 = vweird.f32 %v776_v45  ;;  %vm504_vm13 = vmor %vm502_vm7, %vm503_vm10 }
  0xde   :  { %v1039_v51 = vadd.f32 1.0, %v778_v48  ;;  %781 = vpow2.f32 %v715_v43  ;;  %v214_v52 = vsel %vm211_vm4, %v213_v47, %v209_v49  ;;  %v499_v61 = vsub.f32 1.0, %v498_v53  ;;  %vm223_vm8 = vmor %vm221_vm6, %vm222_vm5  ;;  %v1093_v53 = vpop.permute.xlu1 %109 }
  0xdf   :  { %v1043_v54 = vmul.f32 %v214_v52, %v166_v46  ;;  %v218_v55 = vsub.f32 1.0, %v217_v50  ;;  %v523_v23 = vand.u32 2147483648, %v1036_v42  ;;  %v521_v25 = vand.u32 2147483647, %v1036_v42 }
  0xe0   :  { %783 = vrcp.f32 %v1039_v51  ;;  %v500_v12 = vmul.f32 %v1034_v41, %v499_v61  ;;  %vm517_vm14 = vweird.f32 %v1036_v42  ;;  %v240_v31 = vand.u32 2147483647, %v1039_v51 }
  0xe1   :  { %v266_v58 = vsel %vm265_vm3, %v1043_v54, 0.0  ;;  %v219_v59 = vmul.f32 %v776_v45, %v218_v55  ;;  %v242_v32 = vand.u32 2147483648, %v1039_v51  ;;  %v524_v36 = vor.u32 1.1754944e-38, %v523_v23 }
  0xe2   :  { %267 = vadd.xlane.f32.xlu2 %v266_v58  ;;  %v501_v18 = vadd.f32 %v1034_v41, %v500_v12  ;;  %vm522_vm1 = vcmp.eq.f32.partialorder %v521_v25, 8.507059e+37  ;;  %vm236_vm2 = vweird.f32 %v1039_v51  ;;  %vm241_vm5 = vcmp.eq.f32.partialorder %v240_v31, 8.507059e+37 }
  0xe3   :  { %v780_v63 = vpop.eup %779  ;;  %v220_v8 = vadd.f32 %v776_v45, %v219_v59  ;;  %v243_v44 = vor.u32 1.1754944e-38, %v242_v32  ;;  %v173_v57 = vadd.f32 %v1021_v5, %v1093_v53 }
  0xe4   :  { %v782_v9 = vpop.eup %781  ;;  %v513_v11 = vmul.f32 %v780_v63, %v1036_v42  ;;  %vm518_vm12 = vweird.f32 %v780_v63  ;;  %v505_v30 = vsel %vm504_vm13, %v1034_v41, %v501_v18 }
  0xe5   :  { %v1054_v14 = vadd.f32 1.0, %v782_v9  ;;  %v224_v15 = vsel %vm223_vm8, %v776_v45, %v220_v8  ;;  %v510_v35 = vsel %vm1058_vm11, %v509_v26, %v505_v30  ;;  %vm519_vm0 = vmor %vm517_vm14, %vm518_vm12  ;;  %v477_v8 = vadd.f32 %v476_v62, %v1025_v20 }
  0xe6   :  { %v784_v1 = vpop.eup %783  ;;  %v229_v16 = vsel %vm226_vm9, %v228_v10, %v224_v15  ;;  %v514_v17 = vsub.f32 1.0, %v513_v11  ;;  %v1080_v37 = vmul.f32 %v510_v35, %v1011_v0  ;;  %v171_v0 = vadd.f32 %v1017_v3, %v1083_v39 }
  0xe7   :  { %785 = vrcp.f32 %v1054_v14  ;;  %v1063_v21 = vmul.f32 %v229_v16, %v168_v6  ;;  %v232_v22 = vmul.f32 %v784_v1, %v1039_v51  ;;  %vm237_vm15 = vweird.f32 %v784_v1 }
  0xe8   :  { %v515_v24 = vmul.f32 %v780_v63, %v514_v17  ;;  %vm238_vm4 = vmor %vm236_vm2, %vm237_vm15  ;;  %v257_v50 = vand.u32 2147483648, %v1054_v14  ;;  %v255_v51 = vand.u32 2147483647, %v1054_v14  ;;  %vm251_vm7 = vweird.f32 %v1054_v14 }
  0xe9   :  { %v269_v27 = vsel %vm265_vm3, %v1063_v21, 0.0  ;;  %v233_v29 = vsub.f32 1.0, %v232_v22  ;;  %v745_v10 = vmul.f32 -1.442695, %v477_v8 }
  0xea   :  { %270 = vadd.xlane.f32.xlu0 %v269_v27  ;;  %v516_v33 = vadd.f32 %v780_v63, %v515_v24  ;;  %v258_v3 = vor.u32 1.1754944e-38, %v257_v50  ;;  %vm256_vm9 = vcmp.eq.f32.partialorder %v255_v51, 8.507059e+37 }
  0xeb   :  { %v234_v28 = vmul.f32 %v784_v1, %v233_v29 }
  0xec   :  { %v520_v40 = vsel %vm519_vm0, %v780_v63, %v516_v33  ;;  %v478_v63 = vpop.f32.mrf.mxu3 }
  0xed   :  { %v786_v41 = vpop.eup %785  ;;  %v235_v42 = vadd.f32 %v784_v1, %v234_v28  ;;  %v525_v43 = vsel %vm522_vm1, %v524_v36, %v520_v40  ;;  %v479_v6 = vadd.f32 %v478_v63, %v1031_v34  ;;  %v467_v63 = vadd.f32 %v1019_v4, %v1083_v39 }
  0xee   :  { %v247_v45 = vmul.f32 %v786_v41, %v1054_v14  ;;  %v1087_v46 = vmul.f32 %v525_v43, %v464_v38  ;;  %vm252_vm6 = vweird.f32 %v786_v41 }
  0xef   :  { %v239_v47 = vsel %vm238_vm4, %v784_v1, %v235_v42  ;;  %vm253_vm8 = vmor %vm251_vm7, %vm252_vm6  ;;  %v746_v9 = vmul.f32 -1.442695, %v479_v6  ;;  %vm373_vm6 = vcmask 261120  }
  0xf0   :  { %v244_v2 = vsel %vm241_vm5, %v243_v44, %v239_v47  ;;  %v248_v48 = vsub.f32 1.0, %v247_v45 }
  0xf1   :  { %v263_v49 = vmul.f32 %v244_v2, %v171_v0  ;;  %787 = vpow2.f32 %v746_v9 }
  0xf2   :  { %v249_v52 = vmul.f32 %v786_v41, %v248_v48  ;;  %789 = vpow2.f32 %v745_v10 }
  0xf3   :  { %v272_v55 = vsel %vm265_vm3, %v263_v49, 0.0 }
  0xf4   :  { %273 = vadd.xlane.f32.xlu1 %v272_v55  ;;  %v250_v56 = vadd.f32 %v786_v41, %v249_v52 }
  0xf6   :  { %v254_v58 = vsel %vm253_vm8, %v786_v41, %v250_v56 }
  0xf7   :  { %v259_v59 = vsel %vm256_vm9, %v258_v3, %v254_v58  ;;  %v788_v5 = vpop.eup %787  ;;  %v564_v3 = vsel %vm265_vm3, %v1087_v46, 0.0 }
  0xf8   :  { %v264_v60 = vmul.f32 %v259_v59, %v173_v57  ;;  %v790_v13 = vpop.eup %789  ;;  %v496_v1 = vadd.f32 1.0, %v788_v5  ;;  %v561_v57 = vsel %vm265_vm3, %v1080_v37, 0.0 }
  0xf9   :  { %v495_v16 = vadd.f32 1.0, %v790_v13 }
  0xfa   :  { %v275_v61 = vsel %vm265_vm3, %v264_v60, 0.0  ;;  %791 = vrcp.f32 %v496_v1  ;;  %v553_v47 = vand.u32 2147483648, %v496_v1  ;;  %vm547_vm12 = vweird.f32 %v496_v1 }
  0xfb   :  { %276 = vadd.xlane.f32.xlu2 %v275_v61  ;;  %793 = vrcp.f32 %v495_v16  ;;  %v551_v48 = vand.u32 2147483647, %v496_v1  ;;  %vm532_vm14 = vweird.f32 %v495_v16  ;;  %v536_v52 = vand.u32 2147483647, %v495_v16 }
  0xfc   :  { %v554_v55 = vor.u32 1.1754944e-38, %v553_v47  ;;  %v469_v61 = vadd.f32 %v1023_v7, %v1093_v53 }
  0xfd   :  { %vm552_vm0 = vcmp.eq.f32.partialorder %v551_v48, 8.507059e+37  ;;  %vm537_vm1 = vcmp.eq.f32.partialorder %v536_v52, 8.507059e+37 }
 0x100   :  { %v792_v23 = vpop.eup %791 }
 0x101   :  { %v794_v24 = vpop.eup %793  ;;  %v543_v27 = vmul.f32 %v792_v23, %v496_v1  ;;  %vm548_vm10 = vweird.f32 %v792_v23 }
 0x102   :  { %v528_v29 = vmul.f32 %v794_v24, %v495_v16  ;;  %vm533_vm11 = vweird.f32 %v794_v24  ;;  %vm549_vm13 = vmor %vm547_vm12, %vm548_vm10 }
 0x103   :  { %v544_v32 = vsub.f32 1.0, %v543_v27  ;;  %vm534_vm15 = vmor %vm532_vm14, %vm533_vm11 }
 0x104   :  { %v529_v33 = vsub.f32 1.0, %v528_v29 }
 0x105   :  { %v545_v42 = vmul.f32 %v792_v23, %v544_v32 }
 0x106   :  { %v530_v43 = vmul.f32 %v794_v24, %v529_v33 }
 0x107   :  { %v546_v0 = vadd.f32 %v792_v23, %v545_v42 }
 0x108   :  { %v531_v2 = vadd.f32 %v794_v24, %v530_v43 }
 0x109   :  { %v550_v51 = vsel %vm549_vm13, %v792_v23, %v546_v0 }
 0x10a   :  { %v535_v56 = vsel %vm534_vm15, %v794_v24, %v531_v2 }
 0x155   :  { %v268_v11 = vpop.xlane.xlu2 %267 }
 0x15d   :  { %v271_v12 = vpop.xlane.xlu0 %270 }
 0x15e   :  { %v278_v15 = vadd.f32 %v271_v12, %v268_v11  ;;  %v65_v11 = vld [vmem:[%s1273_s6 + $0x18] sm:$0xff] }
 0x167   :  { %v274_v14 = vpop.xlane.xlu1 %273 }
 0x168   :  { %v279_v17 = vadd.f32 %v278_v15, %v274_v14 }
 0x16e   :  { %v277_v18 = vpop.xlane.xlu2 %276 }
 0x16f   :  { %v280_v19 = vadd.f32 %v279_v17, %v277_v18 }
 0x171   :  { %v281_v34 = vrot.slane %v280_v19, 4 }
 0x173   :  { %v282_v22 = vadd.f32 %v281_v34, %v280_v19 }
 0x175   :  { %v283_v20 = vrot.slane %v282_v22, 2 }
 0x177   :  { %v284_v25 = vadd.f32 %v283_v20, %v282_v22 }
 0x179   :  { %v285_v26 = vrot.slane %v284_v25, 1 }
 0x17b   :  { %v286_v30 = vadd.f32 %v285_v26, %v284_v25 }
 0x17d   :  { %v287_v31 = vmul.f32 0.001953125, %v286_v30 }
 0x17f   :  { %v1102_v35 = vsub.f32 %v263_v49, %v287_v31  ;;  %v1105_v28 = vsub.f32 %v1063_v21, %v287_v31  ;;  %v1108_v36 = vsub.f32 %v1043_v54, %v287_v31  ;;  %v1119_v54 = vsub.f32 %v264_v60, %v287_v31 }
 0x180   :  { %v538_v49 = vand.u32 2147483648, %v495_v16  ;;  %v555_v60 = vsel %vm552_vm0, %v554_v55, %v550_v51  ;;  %v1159_v55 = vld [vmem:[%s1270_s3 + $0x10] sm:$0xff] }
 0x181   :  { %v294_v38 = vmul.f32 %v1102_v35, %v1102_v35  ;;  %v293_v40 = vmul.f32 %v1105_v28, %v1105_v28  ;;  %v292_v41 = vmul.f32 %v1108_v36, %v1108_v36  ;;  %v295_v50 = vmul.f32 %v1119_v54, %v1119_v54 }
 0x182   :  { %v539_v58 = vor.u32 1.1754944e-38, %v538_v49  ;;  %v560_v6 = vmul.f32 %v555_v60, %v469_v61 }
 0x183   :  { %v302_v44 = vsel %vm265_vm3, %v294_v38, 0.0  ;;  %v299_v45 = vsel %vm265_vm3, %v293_v40, 0.0  ;;  %v296_v21 = vsel %vm265_vm3, %v292_v41, 0.0  ;;  %v305_v59 = vsel %vm265_vm3, %v295_v50, 0.0 }
 0x184   :  { %303 = vadd.xlane.f32.xlu1 %v302_v44  ;;  %300 = vadd.xlane.f32.xlu0 %v299_v45  ;;  %v540_v62 = vsel %vm537_vm1, %v539_v58, %v535_v56  ;;  %v570_v9 = vsel %vm265_vm3, %v560_v6, 0.0  ;;  %v1171_v58 = vld [vmem:[%s1270_s3] sm:$0xff] }
 0x185   :  { %297 = vadd.xlane.f32.xlu2 %v296_v21  ;;  %v559_v8 = vmul.f32 %v540_v62, %v467_v63 }
 0x187   :  { %v567_v10 = vsel %vm265_vm3, %v559_v8, 0.0 }
 0x18c   :  { %565 = vadd.xlane.f32.xlu1 %v564_v3  ;;  %562 = vadd.xlane.f32.xlu0 %v561_v57  ;;  %v1166_v3 = vld [vmem:[%s1270_s3 + $0x18] sm:$0xff] }
 0x18d   :  { %306 = vadd.xlane.f32.xlu2 %v305_v59  ;;  %v1176_v59 = vld [vmem:[%s1270_s3 + $0x8] sm:$0xff] }
 0x194   :  { %571 = vadd.xlane.f32.xlu0 %v570_v9 }
 0x195   :  { %568 = vadd.xlane.f32.xlu2 %v567_v10  ;;  %v1200_v10 = vld [vmem:[%s1271_s4] sm:$0xff] }
 0x1a8   :  { %360 = vperm.xlu0 %760, %v65_v11   ;;  %v1205_v11 = vld [vmem:[%s1271_s4 + $0x8] sm:$0xff] }
 0x1f7   :  { %v301_v12 = vpop.xlane.xlu0 %300  ;;  %v304_v53 = vpop.xlane.xlu1 %303 }
 0x1f8   :  { %v298_v7 = vpop.xlane.xlu2 %297 }
 0x1f9   :  { %v308_v5 = vadd.f32 %v301_v12, %v298_v7 }
 0x1fb   :  { %v309_v13 = vadd.f32 %v308_v5, %v304_v53 }
 0x1ff   :  { %v563_v14 = vpop.xlane.xlu0 %562  ;;  %v566_v1 = vpop.xlane.xlu1 %565 }
 0x200   :  { %v307_v4 = vpop.xlane.xlu2 %306  ;;  %v573_v17 = vadd.f32 %v566_v1, %v563_v14  ;;  %v67_v1 = vld [vmem:[%s1275_s8] sm:$0xff] }
 0x201   :  { %v310_v39 = vadd.f32 %v309_v13, %v307_v4  ;;  %v1214_v4 = vld [vmem:[%s1272_s5] sm:$0xff] }
 0x203   :  { %v311_v15 = vrot.slane %v310_v39, 4 }
 0x205   :  { %v312_v16 = vadd.f32 %v311_v15, %v310_v39  ;;  %v63_v39 = vld [vmem:[%s1273_s6 + $0x8] sm:$0xff]  ;;  %v64_v15 = vld [vmem:[%s1273_s6 + $0x10] sm:$0xff] }
 0x207   :  { %v313_v18 = vrot.slane %v312_v16, 2  ;;  %v572_v20 = vpop.xlane.xlu0 %571 }
 0x208   :  { %v569_v19 = vpop.xlane.xlu2 %568 }
 0x209   :  { %v314_v34 = vadd.f32 %v313_v18, %v312_v16  ;;  %v574_v22 = vadd.f32 %v573_v17, %v569_v19  ;;  %v62_v16 = vld [vmem:[%s1273_s6] sm:$0xff]  ;;  %v1233_v17 = vld [vmem:[%s1272_s5 + $0x8] sm:$0xff] }
 0x20b   :  { %v315_v23 = vrot.slane %v314_v34, 1  ;;  %v575_v24 = vadd.f32 %v574_v22, %v572_v20 }
 0x20d   :  { %v316_v25 = vadd.f32 %v315_v23, %v314_v34  ;;  %v576_v26 = vrot.slane %v575_v24, 4 }
 0x20f   :  { %v317_v27 = vmul.f32 0.001953125, %v316_v25  ;;  %v577_v29 = vadd.f32 %v576_v26, %v575_v24 }
 0x211   :  { %v318_v30 = vadd.f32 1e-05, %v317_v27  ;;  %v578_v31 = vrot.slane %v577_v29, 2 }
 0x213   :  { %795 = vrsqrt.f32 %v318_v30  ;;  %v579_v32 = vadd.f32 %v578_v31, %v577_v29  ;;  %vm325_vm4 = vweird.f32 %v318_v30 }
 0x215   :  { %v580_v33 = vrot.slane %v579_v32, 1 }
 0x217   :  { %v581_v38 = vadd.f32 %v580_v33, %v579_v32 }
 0x219   :  { %v796_v40 = vpop.eup %795  ;;  %v582_v41 = vmul.f32 0.001953125, %v581_v38 }
 0x21a   :  { %v320_v42 = vmul.f32 %v796_v40, %v318_v30  ;;  %vm326_vm2 = vweird.f32 %v796_v40  ;;  %v1237_v18 = vpop.permute.xlu0 %360 }
 0x21b   :  { %v1137_v43 = vsub.f32 %v559_v8, %v582_v41  ;;  %v1140_v44 = vsub.f32 %v1087_v46, %v582_v41  ;;  %v1143_v45 = vsub.f32 %v1080_v37, %v582_v41  ;;  %v1154_v37 = vsub.f32 %v560_v6, %v582_v41  ;;  %vm327_vm5 = vmor %vm325_vm4, %vm326_vm2  ;;  %v1185_v6 = vld [vmem:[%s1271_s4 + $0x10] sm:$0xff]  ;;  %v1190_v8 = vld [vmem:[%s1271_s4 + $0x18] sm:$0xff] }
 0x21c   :  { %v321_v21 = vmul.f32 %v796_v40, %v320_v42 }
 0x21d   :  { %v589_v0 = vmul.f32 %v1137_v43, %v1137_v43  ;;  %v588_v47 = vmul.f32 %v1140_v44, %v1140_v44  ;;  %v587_v2 = vmul.f32 %v1143_v45, %v1143_v45  ;;  %v590_v56 = vmul.f32 %v1154_v37, %v1154_v37 }
 0x21e   :  { %v322_v48 = vmul.f32 0.5, %v321_v21 }
 0x21f   :  { %v597_v49 = vsel %vm265_vm3, %v589_v0, 0.0  ;;  %v594_v50 = vsel %vm265_vm3, %v588_v47, 0.0  ;;  %v591_v46 = vsel %vm265_vm3, %v587_v2, 0.0 }
 0x220   :  { %v323_v52 = vsub.f32 1.5, %v322_v48  ;;  %598 = vadd.xlane.f32.xlu0 %v597_v49  ;;  %595 = vadd.xlane.f32.xlu2 %v594_v50 }
 0x221   :  { %592 = vadd.xlane.f32.xlu1 %v591_v46 }
 0x222   :  { %v324_v51 = vmul.f32 %v796_v40, %v323_v52 }
 0x224   :  { %v328_v57 = vsel %vm327_vm5, %v796_v40, %v324_v51 }
 0x225   :  { %v331_v60 = vmul.f32 %v328_v57, %v1102_v35  ;;  %v332_v61 = vmul.f32 %v328_v57, %v1119_v54  ;;  %v329_v62 = vmul.f32 %v328_v57, %v1108_v36  ;;  %v330_v63 = vmul.f32 %v328_v57, %v1105_v28 }
 0x226   :  { %v600_v28 = vsel %vm265_vm3, %v590_v56, 0.0 }
 0x227   :  { %v335_v9 = vmul.f32 %v331_v60, %v1159_v55  ;;  %v336_v35 = vmul.f32 %v332_v61, %v1166_v3  ;;  %v333_v54 = vmul.f32 %v329_v62, %v1171_v58  ;;  %v334_v36 = vmul.f32 %v330_v63, %v1176_v59 }
 0x229   :  { %601 = vadd.xlane.f32.xlu1 %v600_v28  ;;  %v339_v12 = vadd.f32 %v335_v9, %v1185_v6  ;;  %v340_v7 = vadd.f32 %v336_v35, %v1190_v8  ;;  %v337_v5 = vadd.f32 %v333_v54, %v1200_v10  ;;  %v338_v13 = vadd.f32 %v334_v36, %v1205_v11 }
 0x22b   :  { %v342_v53 = vpack.c.bf16 %v340_v7, %v339_v12  ;;  %v341_v14 = vpack.c.bf16 %v338_v13, %v337_v5 }
 0x22d   :  { %386 = vmatpush.bf16.msra.mxu1 %v342_v53 }
 0x231   :  { %387 = vmatpush.bf16.msra.mxu1 %v341_v14 }
 0x234   :  { %724 = vmatmul.msk.bf16.vlgmr.msra.gmra.mxu1 %vm373_vm6, %v1214_v4  ;;  %350 = vperm.xlu0 %760, %v63_v39  }
 0x238   :  { %355 = vperm.xlu2 %762, %v64_v15   ;;  %v66_v15 = vld [vmem:[%s1274_s7] sm:$0xf]  ;;  %s826_s7 = smov [#allocation2]  }
 0x239   :  { %s682_s8 = sshll.u32 %s826_s7, 4  ;;  %s683_s8 = int_to_ptr.vmem [resolvable:$true] %s682_s8 }
 0x240   :  { %407 = vperm.xlu2 %762, %v67_v1  }
 0x242   :  { %345 = vperm.xlu1 %761, %v62_v16  }
 0x244   :  { %725 = vmatmul.msk.bf16.gmra.mxu1 %vm373_vm6, %v1233_v17 }
 0x293   :  { %v596_v19 = vpop.xlane.xlu2 %595  ;;  %v599_v20 = vpop.xlane.xlu0 %598 }
 0x294   :  { %v593_v34 = vpop.xlane.xlu1 %592 }
 0x295   :  { %v603_v22 = vadd.f32 %v596_v19, %v593_v34 }
 0x297   :  { %v604_v23 = vadd.f32 %v603_v22, %v599_v20 }
 0x29b   :  { %v356_v46 = vpop.permute.xlu2 %355 }
 0x29c   :  { %v602_v24 = vpop.xlane.xlu1 %601 }
 0x29d   :  { %v605_v25 = vadd.f32 %v604_v23, %v602_v24 }
 0x29f   :  { %v606_v26 = vrot.slane %v605_v25, 4 }
 0x2a1   :  { %v607_v27 = vadd.f32 %v606_v26, %v605_v25 }
 0x2a3   :  { %v608_v29 = vrot.slane %v607_v27, 2 }
 0x2a5   :  { %v609_v30 = vadd.f32 %v608_v29, %v607_v27 }
 0x2a6   :  { %v351_v56 = vpop.permute.xlu0 %350 }
 0x2a7   :  { %v610_v31 = vrot.slane %v609_v30, 1 }
 0x2a9   :  { %v611_v32 = vadd.f32 %v610_v31, %v609_v30 }
 0x2ab   :  { %v612_v33 = vmul.f32 0.001953125, %v611_v32 }
 0x2ad   :  { %v613_v38 = vadd.f32 1e-05, %v612_v33 }
 0x2af   :  { %797 = vrsqrt.f32 %v613_v38  ;;  %vm620_vm8 = vweird.f32 %v613_v38 }
 0x2b1   :  { %v389_v40 = vpop.f32.mrf.mxu1 }
 0x2b4   :  { %v346_v60 = vpop.permute.xlu1 %345 }
 0x2b5   :  { %v798_v41 = vpop.eup %797  ;;  %v390_v28 = vadd.f32 %v389_v40, %v346_v60 }
 0x2b6   :  { %v615_v42 = vmul.f32 %v798_v41, %v613_v38  ;;  %vm621_vm7 = vweird.f32 %v798_v41 }
 0x2b7   :  { %vm622_vm9 = vmor %vm620_vm8, %vm621_vm7 }
 0x2b8   :  { %v616_v21 = vmul.f32 %v798_v41, %v615_v42 }
 0x2b9   :  { %v391_v0 = vpop.f32.mrf.mxu1 }
 0x2ba   :  { %v617_v47 = vmul.f32 0.5, %v616_v21  ;;  %v392_v62 = vadd.f32 %v391_v0, %v351_v56 }
 0x2bc   :  { %v618_v2 = vsub.f32 1.5, %v617_v47  ;;  %v400_v7 = vmax.f32 %v392_v62, 0.0 }
 0x2be   :  { %v619_v48 = vmul.f32 %v798_v41, %v618_v2 }
 0x2c0   :  { %v623_v50 = vsel %vm622_vm9, %v798_v41, %v619_v48 }
 0x2c1   :  { %v394_v49 = vpop.f32.mrf.mxu1  ;;  %v626_v52 = vmul.f32 %v623_v50, %v1137_v43  ;;  %v627_v51 = vmul.f32 %v623_v50, %v1154_v37  ;;  %v624_v54 = vmul.f32 %v623_v50, %v1143_v45  ;;  %v625_v36 = vmul.f32 %v623_v50, %v1140_v44 }
 0x2c2   :  { %v395_v57 = vadd.f32 %v394_v49, %v356_v46 }
 0x2c3   :  { %v630_v9 = vmul.f32 %v626_v52, %v1159_v55  ;;  %v631_v35 = vmul.f32 %v627_v51, %v1166_v3  ;;  %v628_v13 = vmul.f32 %v624_v54, %v1171_v58  ;;  %v629_v14 = vmul.f32 %v625_v36, %v1176_v59  ;;  %v408_v58 = vpop.permute.xlu2 %407 }
 0x2c4   :  { %v401_v12 = vmax.f32 %v395_v57, 0.0  ;;  %v399_v55 = vmax.f32 %v390_v28, 0.0 }
 0x2c5   :  { %v634_v53 = vadd.f32 %v630_v9, %v1185_v6  ;;  %v635_v5 = vadd.f32 %v631_v35, %v1190_v8  ;;  %v632_v45 = vadd.f32 %v628_v13, %v1200_v10  ;;  %v633_v44 = vadd.f32 %v629_v14, %v1205_v11 }
 0x2c6   :  { %v403_v3 = vpack.c.bf16 %v400_v7, %v399_v55 }
 0x2c7   :  { %v637_v39 = vpack.c.bf16 %v635_v5, %v634_v53  ;;  %v636_v6 = vpack.c.bf16 %v633_v44, %v632_v45 }
 0x2c9   :  { %v396_v61 = vpop.f32.mrf.mxu1 }
 0x2ca   :  { %v397_v63 = vadd.f32 %v396_v61, %v1237_v18 }
 0x2cc   :  { %v402_v43 = vmax.f32 %v397_v63, 0.0 }
 0x2ce   :  { %v404_v37 = vpack.c.bf16 %v402_v43, %v401_v12 }
 0x2d0   :  { %419 = vmatpush.bf16.msra.mxu2 %v404_v37 }
 0x2d4   :  { %420 = vmatpush.bf16.msra.mxu2 %v403_v3 }
 0x2d7   :  { %726 = vmatmul.msk.bf16.vlgmr.msra.gmra.mxu2 %vm373_vm6, %v66_v15 }
 0x2d8   :  { %644 = vmatpush.bf16.msrb.mxu2 %v637_v39 }
 0x2dc   :  { %645 = vmatpush.bf16.msrb.mxu2 %v636_v6 }
 0x2e7   :  { %747 = vmatmul.msk.bf16.vlgmr.msrb.gmra.mxu2 %vm373_vm6, %v1214_v4 }
 0x2f7   :  { %748 = vmatmul.msk.bf16.gmra.mxu2 %vm373_vm6, %v1233_v17 }
 0x35a   :  { %v422_v59 = vpop.f32.mrf.mxu2 }
 0x35b   :  { %v423_v8 = vadd.f32 %v422_v59, %v408_v58 }
 0x35d   :  { %426 = vst.msk [vmem:[#allocation2] sm:$0xff] %vm265_vm3, %v423_v8 }
 0x362   :  { %v424_v10 = vpop.f32.mrf.mxu2 }
 0x36a   :  { %v647_v11 = vpop.f32.mrf.mxu2 }
 0x36b   :  { %v648_v23 = vadd.f32 %v647_v11, %v346_v60 }
 0x36d   :  { %v657_v17 = vmax.f32 %v648_v23, 0.0 }
 0x372   :  { %v649_v1 = vpop.f32.mrf.mxu2 }
 0x373   :  { %v650_v22 = vadd.f32 %v649_v1, %v351_v56 }
 0x375   :  { %v658_v25 = vmax.f32 %v650_v22, 0.0 }
 0x377   :  { %v661_v27 = vpack.c.bf16 %v658_v25, %v657_v17 }
 0x37a   :  { %v652_v16 = vpop.f32.mrf.mxu2 }
 0x37b   :  { %v653_v19 = vadd.f32 %v652_v16, %v356_v46 }
 0x37d   :  { %v659_v24 = vmax.f32 %v653_v19, 0.0 }
 0x382   :  { %v654_v34 = vpop.f32.mrf.mxu2 }
 0x383   :  { %v655_v20 = vadd.f32 %v654_v34, %v1237_v18 }
 0x385   :  { %v660_v4 = vmax.f32 %v655_v20, 0.0 }
 0x387   :  { %v662_v26 = vpack.c.bf16 %v660_v4, %v659_v24 }
 0x389   :  { %669 = vmatpush.bf16.msrb.mxu1 %v662_v26 }
 0x38d   :  { %670 = vmatpush.bf16.msrb.mxu1 %v661_v27 }
 0x390   :  { %749 = vmatmul.msk.bf16.vlgmr.msrb.gmra.mxu1 %vm373_vm6, %v66_v15 }
 0x40d   :  { %v672_v29 = vpop.f32.mrf.mxu1 }
 0x40e   :  { %v673_v18 = vadd.f32 %v672_v29, %v408_v58 }
 0x410   :  { %677 = vst.msk [vmem:[#allocation2 + $0x8] sm:$0xff] %vm265_vm3, %v673_v18 }
 0x411   :  { %690 = dma.vmem_to_hbm [thread:$0]  %s683_s8, 256, %s685_s16, [#allocation3], %s827_s17, %s827_s17, %s828_s18  }
 0x415   :  { %v674_v30 = vpop.f32.mrf.mxu1 }
 0x416   :  { %823 = dma.done.wait [#allocation3], 256  }
 0x417   :  { %824 = vsyncadd [#allocation3], 4294967040 }
 0x418   :  { %695 = vsyncpa [#allocation3], 1 }

</bundles_post_ra>
